<compile_context>
chip_gen: v5e
topology: v5e:2x2
jax: 0.10.0
libtpu: 0.0.40
codegen_flags: <defaults>
</compile_context>

<pallas_src>
import functools

import jax
import jax.numpy as jnp
from jax.experimental import pallas as pl
from jax.experimental.pallas import tpu as pltpu


def _round_up(n, m):
    return ((n + m - 1) // m) * m


def _mlp_kernel(x_ref, w1_ref, b1_ref, w2_ref, b2_ref, w3_ref, b3_ref, o_ref):
    # x arrives already bf16; bf16 operands on the MXU with f32 accumulation,
    # bias add + LeakyReLU in f32 on the VPU.
    h1 = jnp.dot(x_ref[...], w1_ref[...],
                 preferred_element_type=jnp.float32) + b1_ref[...]
    h1 = jnp.maximum(h1, 0.2 * h1)                    # LeakyReLU(0.2)
    # dropout(p=0.1) -> identity (eval mode)

    h2 = jnp.dot(h1.astype(jnp.bfloat16), w2_ref[...],
                 preferred_element_type=jnp.float32) + b2_ref[...]
    h2 = jnp.maximum(h2, 0.2 * h2)                    # LeakyReLU(0.2)
    # dropout(p=0.1) -> identity (eval mode)

    out = jnp.dot(h2.astype(jnp.bfloat16), w3_ref[...],
                  preferred_element_type=jnp.float32) + b3_ref[...]
    o_ref[...] = out.astype(o_ref.dtype)


def prepare_params(params_f32):
    """One-time param prep: pad h1/h2/out widths to multiples of 128, cast
    weights to bf16 (biases stay f32).  Zero padding is semantics-preserving:
    padded columns stay exactly 0 through bias + LeakyReLU and feed zero rows
    of the next (zero-padded) weight.  Returns (packed_params, out_size) with
    out_size kept as a Python int (static)."""
    w1, b1 = params_f32["w1"], params_f32["b1"]
    w2, b2 = params_f32["w2"], params_f32["b2"]
    w3, b3 = params_f32["w3"], params_f32["b3"]

    in_f, h1 = w1.shape
    _, h2 = w2.shape
    _, out = w3.shape
    h1p, h2p, outp = _round_up(h1, 128), _round_up(h2, 128), _round_up(out, 128)

    def pad_w(w, rows, cols):
        return jnp.pad(w, ((0, rows - w.shape[0]), (0, cols - w.shape[1])))

    def pad_b(b, cols):
        return jnp.pad(b, ((0, 0), (0, cols - b.shape[1])))

    packed = {
        "w1": pad_w(w1, in_f, h1p).astype(jnp.bfloat16),
        "b1": pad_b(b1, h1p).astype(jnp.float32),
        "w2": pad_w(w2, h1p, h2p).astype(jnp.bfloat16),
        "b2": pad_b(b2, h2p).astype(jnp.float32),
        "w3": pad_w(w3, h2p, outp).astype(jnp.bfloat16),
        "b3": pad_b(b3, outp).astype(jnp.float32),
    }
    return packed, int(out)


def _num_tensorcores():
    """Best-effort TensorCore count (v7x has 2); falls back to 1."""
    try:
        info = pltpu.get_tpu_info()
        for attr in ("num_cores", "tensorcores_per_chip", "core_count"):
            n = getattr(info, attr, None)
            if n:
                return int(n)
    except Exception:
        pass
    return 1


def _vmem_estimate(block_batch, in_f, h1p, h2p, outp):
    w = 2 * (in_f * h1p + h1p * h2p + h2p * outp)          # bf16 weights, single-buffered
    b = 4 * (h1p + h2p + outp)                             # f32 biases, single-buffered
    io = 2 * (2 * block_batch * in_f) + 2 * (4 * block_batch * outp)  # x(bf16)/out(f32), 2 bufs
    act = 4 * block_batch * (h1p + h2p + outp)             # f32 intermediates
    return w + b + io + act


@functools.partial(jax.jit, static_argnames=("out_size", "block_batch"))
def predictor_forward(x, params, out_size, *, block_batch=None):
    """x: (B, input_size) f32.  params: first element of prepare_params()."""
    w1, b1 = params["w1"], params["b1"]
    w2, b2 = params["w2"], params["b2"]
    w3, b3 = params["w3"], params["b3"]

    B, in_f = x.shape
    h1p, h2p, outp = w1.shape[1], w2.shape[1], w3.shape[1]

    # Batch tiling (tiles are multiples of 16 for bf16 sublane packing):
    #  - 1 TensorCore (v5e/v6e): grid is a serial loop, so use ONE big tile
    #    (up to 1024 rows) and avoid per-step overhead.
    #  - >=2 TensorCores (v7x): make at least 2 parallel grid steps so both
    #    cores get work, with a smaller per-step tile.
    bp = _round_up(max(B, 16), 16)
    if block_batch is None:
        cores = _num_tensorcores()
        if cores >= 2 and bp >= 32:
            block_batch = min(512, _round_up(pl.cdiv(bp, 2), 16))
        else:
            block_batch = min(1024, bp)
    block_batch = max(16, _round_up(block_batch, 16))
    b_pad = _round_up(bp, block_batch)

    # Cast activations to bf16 in the wrapper (halves HBM->VMEM DMA bytes).
    x = x.astype(jnp.bfloat16)
    if b_pad != B:
        x = jnp.pad(x, ((0, b_pad - B), (0, 0)))

    grid = (b_pad // block_batch,)

    # Constant-index weights/biases: single-buffer them (never re-fetched).
    wmode = pl.Buffered(1)
    in_specs = [
        pl.BlockSpec((block_batch, in_f), lambda i: (i, 0)),
        pl.BlockSpec(w1.shape, lambda i: (0, 0), pipeline_mode=wmode),
        pl.BlockSpec(b1.shape, lambda i: (0, 0), pipeline_mode=wmode),
        pl.BlockSpec(w2.shape, lambda i: (0, 0), pipeline_mode=wmode),
        pl.BlockSpec(b2.shape, lambda i: (0, 0), pipeline_mode=wmode),
        pl.BlockSpec(w3.shape, lambda i: (0, 0), pipeline_mode=wmode),
        pl.BlockSpec(b3.shape, lambda i: (0, 0), pipeline_mode=wmode),
    ]
    out_spec = pl.BlockSpec((block_batch, outp), lambda i: (i, 0))

    vmem_limit = min(48 << 20,
                     max(4 << 20,
                         int(1.3 * _vmem_estimate(block_batch, in_f, h1p, h2p, outp))))

    flops = 2 * b_pad * (in_f * h1p + h1p * h2p + h2p * outp)
    bytes_accessed = (2 * b_pad * in_f                     # x (bf16)
                      + 2 * (in_f * h1p + h1p * h2p + h2p * outp)   # weights (bf16)
                      + 4 * (h1p + h2p + outp)             # biases (f32)
                      + 4 * b_pad * outp)                  # output (f32)

    out_padded = pl.pallas_call(
        _mlp_kernel,
        out_shape=jax.ShapeDtypeStruct((b_pad, outp), jnp.float32),
        grid=grid,
        in_specs=in_specs,
        out_specs=out_spec,
        compiler_params=pltpu.CompilerParams(
            dimension_semantics=("parallel",),
            vmem_limit_bytes=vmem_limit,
        ),
        cost_estimate=pl.CostEstimate(flops=flops, transcendentals=0,
                                      bytes_accessed=bytes_accessed),
    )(x, w1, b1, w2, b2, w3, b3)

    # out_size and B are static Python ints here -> static slice.
    return out_padded[:B, :out_size]


def init_params(key, input_size, hidden_size1, hidden_size2, output_size):
    """Deterministic f32 init mirroring nn.Linear (weights stored pre-transposed)."""
    ks = jax.random.split(key, 6)

    def linear(kw, kb, fan_in, fan_out):
        bound = 1.0 / jnp.sqrt(fan_in)
        w = jax.random.uniform(kw, (fan_in, fan_out), jnp.float32, -bound, bound)
        b = jax.random.uniform(kb, (1, fan_out), jnp.float32, -bound, bound)
        return w, b

    w1, b1 = linear(ks[0], ks[1], input_size, hidden_size1)
    w2, b2 = linear(ks[2], ks[3], hidden_size1, hidden_size2)
    w3, b3 = linear(ks[4], ks[5], hidden_size2, output_size)
    return {"w1": w1, "b1": b1, "w2": w2, "b2": b2, "w3": w3, "b3": b3}


def _reference_bf16(x, prepared, out_size):
    """Same bf16-operand / f32-accumulate math as the kernel, in plain XLA."""
    def leaky(v):
        return jnp.maximum(v, 0.2 * v)

    xb = x.astype(jnp.bfloat16)
    h1 = leaky(jnp.dot(xb, prepared["w1"],
                       preferred_element_type=jnp.float32) + prepared["b1"])
    h2 = leaky(jnp.dot(h1.astype(jnp.bfloat16), prepared["w2"],
                       preferred_element_type=jnp.float32) + prepared["b2"])
    out = jnp.dot(h2.astype(jnp.bfloat16), prepared["w3"],
                  preferred_element_type=jnp.float32) + prepared["b3"]
    return out[:, :out_size]


def _reference_f32(x, params_f32):
    """Pure f32 forward matching the PyTorch module (eval mode)."""
    def leaky(v):
        return jnp.where(v >= 0.0, v, 0.2 * v)

    h1 = leaky(x @ params_f32["w1"] + params_f32["b1"])
    h2 = leaky(h1 @ params_f32["w2"] + params_f32["b2"])
    return h2 @ params_f32["w3"] + params_f32["b3"]


if __name__ == "__main__":
    key = jax.random.PRNGKey(0)
    k_x, k_p = jax.random.split(key)

    # Small shapes consistent with the module: batch=8, input=32, h1=64, h2=64, out=16
    B, IN, H1, H2, OUT = 8, 32, 64, 64, 16

    x = jax.random.normal(k_x, (B, IN), jnp.float32)
    params_f32 = init_params(k_p, IN, H1, H2, OUT)
    params, out_size = prepare_params(params_f32)

    out = predictor_forward(x, params, out_size)
    out = jax.block_until_ready(out)
    assert out.shape == (B, OUT)

    # 1) exact-path check: kernel vs identical bf16/f32-accum math in XLA
    ref_bf16 = _reference_bf16(x, params, out_size)
    assert jnp.allclose(out, ref_bf16, atol=2e-2, rtol=2e-2), float(
        jnp.max(jnp.abs(out - ref_bf16)))

    # 2) precision-drift check: kernel vs pure-f32 reference (PyTorch semantics)
    ref_f32 = _reference_f32(x, params_f32)
    assert jnp.allclose(out, ref_f32, atol=1e-1, rtol=1e-1), float(
        jnp.max(jnp.abs(out - ref_f32)))

    print("KERNEL_OK")
</pallas_src>

<mosaic_0001>
module attributes {stable_mosaic.version = 11 : i64} {
  func.func @_mlp_kernel(%arg0: i32, %arg1: memref<16x32xbf16, #tpu.memory_space<vmem>>, %arg2: memref<32x128xbf16, #tpu.memory_space<vmem>>, %arg3: memref<1x128xf32, #tpu.memory_space<vmem>>, %arg4: memref<128x128xbf16, #tpu.memory_space<vmem>>, %arg5: memref<1x128xf32, #tpu.memory_space<vmem>>, %arg6: memref<128x128xbf16, #tpu.memory_space<vmem>>, %arg7: memref<1x128xf32, #tpu.memory_space<vmem>>, %arg8: memref<16x128xf32, #tpu.memory_space<vmem>>) attributes {dimension_semantics = [#tpu.dimension_semantics<parallel>], iteration_bounds = array<i64: 1>, scalar_prefetch = 0 : i64, scratch_operands = 0 : i64, tpu.core_type = #tpu.core_type<tc>, window_params = [{transform_indices = @transform_0, window_bounds = array<i64: 16, 32>}, {pipeline_mode = #tpu.pipeline_mode<synchronous>, transform_indices = @transform_1, window_bounds = array<i64: 32, 128>}, {pipeline_mode = #tpu.pipeline_mode<synchronous>, transform_indices = @transform_2, window_bounds = array<i64: 1, 128>}, {pipeline_mode = #tpu.pipeline_mode<synchronous>, transform_indices = @transform_3, window_bounds = array<i64: 128, 128>}, {pipeline_mode = #tpu.pipeline_mode<synchronous>, transform_indices = @transform_4, window_bounds = array<i64: 1, 128>}, {pipeline_mode = #tpu.pipeline_mode<synchronous>, transform_indices = @transform_5, window_bounds = array<i64: 128, 128>}, {pipeline_mode = #tpu.pipeline_mode<synchronous>, transform_indices = @transform_6, window_bounds = array<i64: 1, 128>}, {transform_indices = @transform_7, window_bounds = array<i64: 16, 128>}]} {
    %c0 = arith.constant 0 : index
    %c0_0 = arith.constant 0 : index
    %0 = vector.load %arg1[%c0, %c0_0] : memref<16x32xbf16, #tpu.memory_space<vmem>>, vector<16x32xbf16>
    %c0_1 = arith.constant 0 : index
    %c0_2 = arith.constant 0 : index
    %1 = vector.load %arg2[%c0_1, %c0_2] : memref<32x128xbf16, #tpu.memory_space<vmem>>, vector<32x128xbf16>
    %cst = arith.constant dense<0.000000e+00> : vector<16x128xf32>
    %2 = tpu.matmul %0, %1, %cst {dimension_numbers = #tpu.dot_dimension_numbers<[1], [0], [0], [1], [0, 0, 1, 1], [], []>} : vector<16x32xbf16>, vector<32x128xbf16>, vector<16x128xf32> -> vector<16x128xf32>
    %c0_3 = arith.constant 0 : index
    %c0_4 = arith.constant 0 : index
    %3 = vector.load %arg3[%c0_3, %c0_4] : memref<1x128xf32, #tpu.memory_space<vmem>>, vector<1x128xf32>
    %4 = vector.broadcast %3 : vector<1x128xf32> to vector<16x128xf32>
    %5 = arith.addf %2, %4 : vector<16x128xf32>
    %cst_5 = arith.constant 2.000000e-01 : f32
    %6 = vector.broadcast %cst_5 : f32 to vector<16x128xf32>
    %7 = arith.mulf %6, %5 : vector<16x128xf32>
    %8 = arith.maximumf %5, %7 : vector<16x128xf32>
    %9 = arith.truncf %8 : vector<16x128xf32> to vector<16x128xbf16>
    %c0_6 = arith.constant 0 : index
    %c0_7 = arith.constant 0 : index
    %10 = vector.load %arg4[%c0_6, %c0_7] : memref<128x128xbf16, #tpu.memory_space<vmem>>, vector<128x128xbf16>
    %cst_8 = arith.constant dense<0.000000e+00> : vector<16x128xf32>
    %11 = tpu.matmul %9, %10, %cst_8 {dimension_numbers = #tpu.dot_dimension_numbers<[1], [0], [0], [1], [0, 0, 1, 1], [], []>} : vector<16x128xbf16>, vector<128x128xbf16>, vector<16x128xf32> -> vector<16x128xf32>
    %c0_9 = arith.constant 0 : index
    %c0_10 = arith.constant 0 : index
    %12 = vector.load %arg5[%c0_9, %c0_10] : memref<1x128xf32, #tpu.memory_space<vmem>>, vector<1x128xf32>
    %13 = vector.broadcast %12 : vector<1x128xf32> to vector<16x128xf32>
    %14 = arith.addf %11, %13 : vector<16x128xf32>
    %cst_11 = arith.constant 2.000000e-01 : f32
    %15 = vector.broadcast %cst_11 : f32 to vector<16x128xf32>
    %16 = arith.mulf %15, %14 : vector<16x128xf32>
    %17 = arith.maximumf %14, %16 : vector<16x128xf32>
    %18 = arith.truncf %17 : vector<16x128xf32> to vector<16x128xbf16>
    %c0_12 = arith.constant 0 : index
    %c0_13 = arith.constant 0 : index
    %19 = vector.load %arg6[%c0_12, %c0_13] : memref<128x128xbf16, #tpu.memory_space<vmem>>, vector<128x128xbf16>
    %cst_14 = arith.constant dense<0.000000e+00> : vector<16x128xf32>
    %20 = tpu.matmul %18, %19, %cst_14 {dimension_numbers = #tpu.dot_dimension_numbers<[1], [0], [0], [1], [0, 0, 1, 1], [], []>} : vector<16x128xbf16>, vector<128x128xbf16>, vector<16x128xf32> -> vector<16x128xf32>
    %c0_15 = arith.constant 0 : index
    %c0_16 = arith.constant 0 : index
    %21 = vector.load %arg7[%c0_15, %c0_16] : memref<1x128xf32, #tpu.memory_space<vmem>>, vector<1x128xf32>
    %22 = vector.broadcast %21 : vector<1x128xf32> to vector<16x128xf32>
    %23 = arith.addf %20, %22 : vector<16x128xf32>
    %c0_17 = arith.constant 0 : index
    %c0_18 = arith.constant 0 : index
    %24 = vector.load %arg8[%c0_17, %c0_18] : memref<16x128xf32, #tpu.memory_space<vmem>>, vector<16x128xf32>
    tpu.vector_store %arg8[%c0_17, %c0_18], %23 {strides = array<i32>} : memref<16x128xf32, #tpu.memory_space<vmem>>, vector<16x128xf32>,
    return
  }
  func.func @transform_0(%arg0: i32) -> (i32, i32) {
    %c0_i32 = arith.constant 0 : i32
    %c0_i32_0 = arith.constant 0 : i32
    return %arg0, %c0_i32 : i32, i32
  }
  func.func @transform_1(%arg0: i32) -> (i32, i32) {
    %c0_i32 = arith.constant 0 : i32
    %c0_i32_0 = arith.constant 0 : i32
    %c0_i32_1 = arith.constant 0 : i32
    return %c0_i32, %c0_i32_0 : i32, i32
  }
  func.func @transform_2(%arg0: i32) -> (i32, i32) {
    %c0_i32 = arith.constant 0 : i32
    %c0_i32_0 = arith.constant 0 : i32
    %c0_i32_1 = arith.constant 0 : i32
    return %c0_i32, %c0_i32_0 : i32, i32
  }
  func.func @transform_3(%arg0: i32) -> (i32, i32) {
    %c0_i32 = arith.constant 0 : i32
    %c0_i32_0 = arith.constant 0 : i32
    %c0_i32_1 = arith.constant 0 : i32
    return %c0_i32, %c0_i32_0 : i32, i32
  }
  func.func @transform_4(%arg0: i32) -> (i32, i32) {
    %c0_i32 = arith.constant 0 : i32
    %c0_i32_0 = arith.constant 0 : i32
    %c0_i32_1 = arith.constant 0 : i32
    return %c0_i32, %c0_i32_0 : i32, i32
  }
  func.func @transform_5(%arg0: i32) -> (i32, i32) {
    %c0_i32 = arith.constant 0 : i32
    %c0_i32_0 = arith.constant 0 : i32
    %c0_i32_1 = arith.constant 0 : i32
    return %c0_i32, %c0_i32_0 : i32, i32
  }
  func.func @transform_6(%arg0: i32) -> (i32, i32) {
    %c0_i32 = arith.constant 0 : i32
    %c0_i32_0 = arith.constant 0 : i32
    %c0_i32_1 = arith.constant 0 : i32
    return %c0_i32, %c0_i32_0 : i32, i32
  }
  func.func @transform_7(%arg0: i32) -> (i32, i32) {
    %c0_i32 = arith.constant 0 : i32
    %c0_i32_0 = arith.constant 0 : i32
    return %arg0, %c0_i32 : i32, i32
  }
}

</mosaic_0001>

<bundles_post_ra>
// kernel: predictor_forward.1
= control target key start
LH: loop header
LB: loop body
LE: loop exit
PB: predicated region body
PF: predicated region fallthrough
CT: control target
= control target key end

     0   :  { %12 = vsyncpa [#allocation3], 0  ;;  %s515_s0 = inlined_call_operand.vmem [shape: bf16[16,32], index: 0, kind: input, shape index: {}]   ;;  %s516_s1 = inlined_call_operand.vmem [shape: bf16[32,128], index: 1, kind: input, shape index: {}]   ;;  %s517_s2 = inlined_call_operand.vmem [shape: f32[1,128], index: 2, kind: input, shape index: {}]   ;;  %s518_s3 = inlined_call_operand.hbm [shape: bf16[128,128], index: 3, kind: input, shape index: {}]   ;;  %s519_s4 = inlined_call_operand.vmem [shape: f32[1,128], index: 4, kind: input, shape index: {}]   ;;  %s520_s5 = inlined_call_operand.hbm [shape: bf16[128,128], index: 5, kind: input, shape index: {}]   ;;  %s521_s6 = inlined_call_operand.vmem [shape: f32[1,128], index: 6, kind: input, shape index: {}]   ;;  %s522_s7 = inlined_call_operand.vmem [shape: f32[16,128], index: 7, kind: output, shape index: {}]  }
   0x1   :  { %s24_s26 = sshll.u32 %s518_s3, 4  ;;  %s25_s26 = int_to_ptr.hbm [resolvable:$true] %s24_s26 }
   0x2   :  { %13 = vsyncpa [#allocation5], 0  ;;  %s441_s27 = smov [#allocation2]   ;;  %s39_s8 = sshll.u32 %s520_s5, 4  ;;  %s40_s8 = int_to_ptr.hbm [resolvable:$true] %s39_s8 }
   0x3   :  { %s26_s28 = sshll.u32 %s441_s27, 4  ;;  %s442_s9 = smov 64   ;;  %s27_s28 = int_to_ptr.vmem [resolvable:$true] %s26_s28 }
   0x4   :  { %s443_s10 = smov 4   ;;  %s444_s11 = smov [#allocation4]  }
   0x5   :  { %32 = dma.hbm_to_vmem [thread:$0]  %s25_s26, 1024, %s27_s28, [#allocation3], %s442_s9, %s442_s9, %s443_s10  }
   0x6   :  { %s41_s12 = sshll.u32 %s444_s11, 4  ;;  %s42_s12 = int_to_ptr.vmem [resolvable:$true] %s41_s12 }
   0x7   :  { %47 = dma.hbm_to_vmem [thread:$0]  %s40_s8, 1024, %s42_s12, [#allocation5], %s442_s9, %s442_s9, %s443_s10  }
   0x8   :  { %437 = dma.done.wait [#allocation3], 1024  }
   0x9   :  { %438 = vsyncadd [#allocation3], 4294966272 }
   0xa   :  { %439 = dma.done.wait [#allocation5], 1024  }
   0xb   :  { %440 = vsyncadd [#allocation5], 4294966272  ;;  %v365_v0 = vld [vmem:[%s516_s1 + $0x8] sm:$0xff]  ;;  %v364_v2 = vld [vmem:[%s516_s1] sm:$0xff]  ;;  %vm86_vm0 = vcmask 261120  }
   0xc   :  { %v373_v1 = vld [vmem:[#allocation2 + $0x38] sm:$0xff]  ;;  %96 = vmatpush.bf16.msra.mxu0 %v365_v0  ;;  %v372_v3 = vld [vmem:[#allocation2 + $0x30] sm:$0xff]  ;;  %v371_v5 = vld [vmem:[#allocation2 + $0x28] sm:$0xff] }
   0xd   :  { %177 = vmatpush.bf16.msra.mxu1 %v373_v1  ;;  %v363_v4 = vld [vmem:[%s515_s0] sm:$0xff]  ;;  %v370_v6 = vld [vmem:[#allocation2 + $0x20] sm:$0xff]  ;;  %v369_v7 = vld [vmem:[#allocation2 + $0x18] sm:$0xff] }
   0xe   :  { %v368_v8 = vld [vmem:[#allocation2 + $0x10] sm:$0xff]  ;;  %v367_v9 = vld [vmem:[#allocation2 + $0x8] sm:$0xff]  ;;  %v366_v10 = vld [vmem:[#allocation2] sm:$0xff] }
   0xf   :  { %v381_v11 = vld [vmem:[#allocation4 + $0x38] sm:$0xff]  ;;  %v380_v12 = vld [vmem:[#allocation4 + $0x30] sm:$0xff]  ;;  %v379_v13 = vld [vmem:[#allocation4 + $0x28] sm:$0xff] }
  0x10   :  { %97 = vmatpush.bf16.msra.mxu0 %v364_v2  ;;  %264 = vmatpush.bf16.msra.mxu2 %v381_v11  ;;  %v378_v14 = vld [vmem:[#allocation4 + $0x20] sm:$0xff]  ;;  %v386_v16 = vld [vmem:[%s517_s2] ss:$0 sm:$0xff]  ;;  %v377_v25 = vld [vmem:[#allocation4 + $0x18] sm:$0xff] }
  0x11   :  { %178 = vmatpush.bf16.msra.mxu1 %v372_v3  ;;  %v376_v26 = vld [vmem:[#allocation4 + $0x10] sm:$0xff]  ;;  %v375_v27 = vld [vmem:[#allocation4 + $0x8] sm:$0xff]  ;;  %v374_v28 = vld [vmem:[#allocation4] sm:$0xff] }
  0x12   :  { %v387_v30 = vld [vmem:[%s519_s4] ss:$0 sm:$0xff] }
  0x13   :  { %298 = vmatmul.msk.bf16.vlgmr.msra.gmra.mxu0 %vm86_vm0, %v363_v4  ;;  %v388_v39 = vld [vmem:[%s521_s6] ss:$0 sm:$0xff] }
  0x14   :  { %265 = vmatpush.bf16.msra.mxu2 %v380_v12 }
  0x15   :  { %179 = vmatpush.bf16.msra.mxu1 %v371_v5 }
  0x18   :  { %266 = vmatpush.bf16.msra.mxu2 %v379_v13 }
  0x19   :  { %180 = vmatpush.bf16.msra.mxu1 %v370_v6 }
  0x1c   :  { %267 = vmatpush.bf16.msra.mxu2 %v378_v14 }
  0x1d   :  { %181 = vmatpush.bf16.msra.mxu1 %v369_v7 }
  0x20   :  { %268 = vmatpush.bf16.msra.mxu2 %v377_v25 }
  0x21   :  { %182 = vmatpush.bf16.msra.mxu1 %v368_v8 }
  0x24   :  { %269 = vmatpush.bf16.msra.mxu2 %v376_v26 }
  0x25   :  { %183 = vmatpush.bf16.msra.mxu1 %v367_v9 }
  0x28   :  { %270 = vmatpush.bf16.msra.mxu2 %v375_v27 }
  0x29   :  { %184 = vmatpush.bf16.msra.mxu1 %v366_v10 }
  0x2c   :  { %271 = vmatpush.bf16.msra.mxu2 %v374_v28 }
  0x90   :  { %v99_v15 = vpop.f32.mrf.mxu0 }
  0x91   :  { %v100_v17 = vadd.f32 %v386_v16, %v99_v15 }
  0x93   :  { %v104_v19 = vmul.f32 0.2, %v100_v17 }
  0x95   :  { %v106_v22 = vmax.f32 %v100_v17, %v104_v19 }
  0x98   :  { %v101_v18 = vpop.f32.mrf.mxu0 }
  0x99   :  { %v102_v20 = vadd.f32 %v386_v16, %v101_v18 }
  0x9b   :  { %v105_v21 = vmul.f32 0.2, %v102_v20 }
  0x9d   :  { %v107_v23 = vmax.f32 %v102_v20, %v105_v21 }
  0x9f   :  { %v108_v24 = vpack.c.bf16 %v107_v23, %v106_v22 }
  0xa1   :  { %185 = vmatmul.bf16.vlgmr.msra.gmra.mxu1 %v108_v24 }
 0x11e   :  { %v186_v29 = vpop.f32.mrf.mxu1 }
 0x11f   :  { %v187_v31 = vadd.f32 %v387_v30, %v186_v29 }
 0x121   :  { %v191_v33 = vmul.f32 0.2, %v187_v31 }
 0x123   :  { %v193_v36 = vmax.f32 %v187_v31, %v191_v33 }
 0x126   :  { %v188_v32 = vpop.f32.mrf.mxu1 }
 0x127   :  { %v189_v34 = vadd.f32 %v387_v30, %v188_v32 }
 0x129   :  { %v192_v35 = vmul.f32 0.2, %v189_v34 }
 0x12b   :  { %v194_v37 = vmax.f32 %v189_v34, %v192_v35 }
 0x12d   :  { %v195_v38 = vpack.c.bf16 %v194_v37, %v193_v36 }
 0x12f   :  { %272 = vmatmul.bf16.vlgmr.msra.gmra.mxu2 %v195_v38 }
 0x1b2   :  { %v273_v40 = vpop.f32.mrf.mxu2 }
 0x1b3   :  { %v274_v41 = vadd.f32 %v388_v39, %v273_v40 }
 0x1b5   :  { %278 = vst [vmem:[%s522_s7] sm:$0xff] %v274_v41 }
 0x1ba   :  { %v275_v42 = vpop.f32.mrf.mxu2 }
 0x1bb   :  { %v276_v43 = vadd.f32 %v388_v39, %v275_v42 }
 0x1bd   :  { %279 = vst [vmem:[%s522_s7 + $0x8] sm:$0xff] %v276_v43 }
 0x1be   :  { %284 = vsyncpa [#allocation3], 1 }
 0x1bf   :  { %285 = vsyncpa [#allocation5], 1 }

</bundles_post_ra>
